<compile_context>
chip_gen: v7x
topology: tpu7x:2x2x1
jax: 0.10.0
libtpu: 0.0.40
codegen_flags: <defaults>
</compile_context>

<pallas_src>
import jax
import jax.numpy as jnp
from jax.experimental import pallas as pl
from jax.experimental.pallas import tpu as pltpu

SELU_ALPHA = 1.6732632423543772
SELU_SCALE = 1.0507009873554805


def _selu(x):
    # scale * (max(0, x) + min(0, alpha * (exp(x) - 1))) -- computed in f32.
    return SELU_SCALE * jnp.where(x > 0, x, SELU_ALPHA * (jnp.exp(x) - 1.0))


def _round_up(v, m):
    return (v + m - 1) // m * m


def _pad2d(a, rows, cols):
    return jnp.pad(a, ((0, rows - a.shape[0]), (0, cols - a.shape[1])))


# ---------------------------------------------------------------------------
# Pass A: support = x @ W      (row-tiled; weight resident in VMEM)
# ---------------------------------------------------------------------------
def _xw_kernel(x_ref, w_ref, o_ref):
    o_ref[...] = jnp.dot(
        x_ref[...], w_ref[...], preferred_element_type=jnp.float32
    ).astype(o_ref.dtype)


def _xw(x, w, *, block_m, out_dtype):
    n, fin = x.shape
    fout = w.shape[1]
    return pl.pallas_call(
        _xw_kernel,
        out_shape=jax.ShapeDtypeStruct((n, fout), out_dtype),
        grid=(n // block_m,),
        in_specs=[
            pl.BlockSpec((block_m, fin), lambda i: (i, 0)),
            pl.BlockSpec((fin, fout), lambda i: (0, 0)),      # resident weight
        ],
        out_specs=pl.BlockSpec((block_m, fout), lambda i: (i, 0)),
        compiler_params=pltpu.CompilerParams(
            dimension_semantics=("parallel",),
            vmem_limit_bytes=32 * 1024 * 1024,
        ),
        cost_estimate=pl.CostEstimate(
            flops=2 * n * fin * fout,
            transcendentals=0,
            bytes_accessed=(n * fin + fin * fout) * x.dtype.itemsize + n * fout * 4,
        ),
    )(x, w)


# ---------------------------------------------------------------------------
# Pass B/C: out = selu(adj @ support + b) [@ W_next]
#   grid = (row tiles, k tiles); k is a reduction into an f32 VMEM accumulator.
# ---------------------------------------------------------------------------
def _agg_selu_kernel(adj_ref, s_ref, b_ref, o_ref, acc_ref):
    k = pl.program_id(1)

    @pl.when(k == 0)
    def _():
        acc_ref[...] = jnp.zeros_like(acc_ref)

    acc_ref[...] += jnp.dot(
        adj_ref[...], s_ref[...], preferred_element_type=jnp.float32
    )

    @pl.when(k == pl.num_programs(1) - 1)
    def _():
        o_ref[...] = _selu(acc_ref[...] + b_ref[...]).astype(o_ref.dtype)


def _agg_selu_matmul_kernel(adj_ref, s_ref, b_ref, w_ref, o_ref, acc_ref):
    k = pl.program_id(1)

    @pl.when(k == 0)
    def _():
        acc_ref[...] = jnp.zeros_like(acc_ref)

    acc_ref[...] += jnp.dot(
        adj_ref[...], s_ref[...], preferred_element_type=jnp.float32
    )

    @pl.when(k == pl.num_programs(1) - 1)
    def _():
        h = _selu(acc_ref[...] + b_ref[...])          # f32 bias add + SELU
        # TODO(synk): training-mode dropout (p=0.4) would need pltpu.prng_* masking;
        # inference (train=False) is identity, so nothing to do here.
        o_ref[...] = jnp.dot(
            h.astype(w_ref.dtype), w_ref[...], preferred_element_type=jnp.float32
        ).astype(o_ref.dtype)


def _aggregate(adj, support, bias, w_next, *, block_n, out_dtype):
    n = adj.shape[0]
    f_in = support.shape[1]
    grid = (n // block_n, n // block_n)

    in_specs = [
        pl.BlockSpec((block_n, block_n), lambda i, k: (i, k)),   # adj tile, streamed
        pl.BlockSpec((block_n, f_in), lambda i, k: (k, 0)),      # support k-rows
        pl.BlockSpec((1, f_in), lambda i, k: (0, 0)),            # bias, resident
    ]
    args = [adj, support, bias]
    flops = 2 * n * n * f_in
    bytes_accessed = (n * n + n * f_in) * adj.dtype.itemsize + f_in * 4

    if w_next is None:
        kernel = _agg_selu_kernel
        f_out = f_in
    else:
        kernel = _agg_selu_matmul_kernel
        f_out = w_next.shape[1]
        in_specs.append(pl.BlockSpec((f_in, f_out), lambda i, k: (0, 0)))  # resident
        args.append(w_next)
        flops += 2 * n * f_in * f_out
        bytes_accessed += f_in * f_out * w_next.dtype.itemsize

    return pl.pallas_call(
        kernel,
        out_shape=jax.ShapeDtypeStruct((n, f_out), out_dtype),
        grid=grid,
        in_specs=in_specs,
        out_specs=pl.BlockSpec((block_n, f_out), lambda i, k: (i, 0)),
        scratch_shapes=[pltpu.VMEM((block_n, f_in), jnp.float32)],
        compiler_params=pltpu.CompilerParams(
            dimension_semantics=("parallel", "arbitrary"),
            vmem_limit_bytes=32 * 1024 * 1024,   # safe on v5e/v6e/v7x for these tiles
        ),
        cost_estimate=pl.CostEstimate(
            flops=flops,
            transcendentals=n * f_in,
            bytes_accessed=bytes_accessed + n * f_out * 4,
        ),
    )(*args)


# ---------------------------------------------------------------------------
# Full forward
# ---------------------------------------------------------------------------
def gcn_forward(x, adj, w1, b1, w2, b2, *, block_n=128, compute_dtype=jnp.float32):
    """out = selu(adj @ (selu(adj @ (x @ W1) + b1) @ W2) + b2)  (inference)."""
    n, fin = x.shape
    hid = w1.shape[1]
    fout = w2.shape[1]
    assert block_n % 128 == 0, "block_n must be a multiple of 128 (lane-dense adj tiles)"

    n_pad = _round_up(n, block_n)
    hid_pad = _round_up(hid, 128)
    out_pad = _round_up(fout, 128)

    # Zero padding is mathematically inert (zero adj columns / zero weight rows &
    # columns -> padded features stay exactly 0 through SELU) and is sliced off.
    x_p = _pad2d(x, n_pad, fin).astype(compute_dtype)
    adj_p = _pad2d(adj, n_pad, n_pad).astype(compute_dtype)
    w1_p = _pad2d(w1, fin, hid_pad).astype(compute_dtype)
    w2_p = _pad2d(w2, hid_pad, out_pad).astype(compute_dtype)
    b1_p = _pad2d(b1.reshape(1, -1), 1, hid_pad).astype(jnp.float32)
    b2_p = _pad2d(b2.reshape(1, -1), 1, out_pad).astype(jnp.float32)

    # Pass A: support1 = x @ W1 (tiny, row-tiled).
    support1 = _xw(x_p, w1_p, block_m=block_n, out_dtype=compute_dtype)
    # Pass B: support2 = selu(adj @ support1 + b1) @ W2 (dropout identity in eval).
    support2 = _aggregate(adj_p, support1, b1_p, w2_p,
                          block_n=block_n, out_dtype=compute_dtype)
    # Pass C: out = selu(adj @ support2 + b2)  (always written back in f32).
    out = _aggregate(adj_p, support2, b2_p, None,
                     block_n=block_n, out_dtype=jnp.float32)
    return out[:n, :fout]


def reference_forward(x, adj, w1, b1, w2, b2):
    h = jax.nn.selu(adj @ (x @ w1) + b1)
    return jax.nn.selu(adj @ (h @ w2) + b2)


if __name__ == "__main__":
    N, INFEAT, HIDFEAT, OUTFEAT = 256, 16, 32, 8

    key = jax.random.PRNGKey(0)
    kx, kadj, kw1, kb1, kw2, kb2 = jax.random.split(key, 6)

    x = jax.random.normal(kx, (N, INFEAT), dtype=jnp.float32)

    # Symmetric, row-normalized adjacency with self loops (typical GCN input).
    a = (jax.random.uniform(kadj, (N, N)) > 0.7).astype(jnp.float32)
    a = jnp.maximum(a, a.T) + jnp.eye(N, dtype=jnp.float32)
    adj = a / jnp.sum(a, axis=1, keepdims=True)

    # Deterministic parameter init (uniform, GraphConvolution-style).
    def init_w(k, fan_in, fan_out):
        bound = 1.0 / jnp.sqrt(fan_in)
        return jax.random.uniform(k, (fan_in, fan_out), jnp.float32, -bound, bound)

    w1 = init_w(kw1, INFEAT, HIDFEAT)
    b1 = jax.random.uniform(kb1, (HIDFEAT,), jnp.float32, -0.1, 0.1)
    w2 = init_w(kw2, HIDFEAT, OUTFEAT)
    b2 = jax.random.uniform(kb2, (OUTFEAT,), jnp.float32, -0.1, 0.1)

    ref = reference_forward(x, adj, w1, b1, w2, b2)

    # f32 streaming path: must match the reference tightly.
    out_f32 = jax.block_until_ready(
        gcn_forward(x, adj, w1, b1, w2, b2, block_n=128, compute_dtype=jnp.float32))
    assert out_f32.shape == (N, OUTFEAT)
    assert jnp.allclose(out_f32, ref, atol=1e-5, rtol=1e-5)

    # Bandwidth-optimized path: bf16 adj/activation streaming, f32 accumulate/SELU.
    out_bf16 = jax.block_until_ready(
        gcn_forward(x, adj, w1, b1, w2, b2, block_n=128, compute_dtype=jnp.bfloat16))
    assert out_bf16.shape == (N, OUTFEAT)
    assert jnp.allclose(out_bf16, ref, atol=5e-2, rtol=0.0)

    print("KERNEL_OK")
</pallas_src>

<mosaic_0001>
module attributes {stable_mosaic.version = 11 : i64} {
  func.func @_xw_kernel(%arg0: i32, %arg1: memref<128x16xf32, #tpu.memory_space<vmem>>, %arg2: memref<16x128xf32, #tpu.memory_space<vmem>>, %arg3: memref<128x128xf32, #tpu.memory_space<vmem>>) attributes {dimension_semantics = [#tpu.dimension_semantics<parallel>], iteration_bounds = array<i64: 2>, scalar_prefetch = 0 : i64, scratch_operands = 0 : i64, tpu.core_type = #tpu.core_type<tc>, window_params = [{transform_indices = @transform_0, window_bounds = array<i64: 128, 16>}, {pipeline_mode = #tpu.pipeline_mode<synchronous>, transform_indices = @transform_1, window_bounds = array<i64: 16, 128>}, {transform_indices = @transform_2, window_bounds = array<i64: 128, 128>}]} {
    %c0 = arith.constant 0 : index
    %c0_0 = arith.constant 0 : index
    %0 = vector.load %arg1[%c0, %c0_0] : memref<128x16xf32, #tpu.memory_space<vmem>>, vector<128x16xf32>
    %c0_1 = arith.constant 0 : index
    %c0_2 = arith.constant 0 : index
    %1 = vector.load %arg2[%c0_1, %c0_2] : memref<16x128xf32, #tpu.memory_space<vmem>>, vector<16x128xf32>
    %cst = arith.constant dense<0.000000e+00> : vector<128x128xf32>
    %2 = tpu.matmul %0, %1, %cst {dimension_numbers = #tpu.dot_dimension_numbers<[1], [0], [0], [1], [0, 0, 1, 1], [], []>} : vector<128x16xf32>, vector<16x128xf32>, vector<128x128xf32> -> vector<128x128xf32>
    %c0_3 = arith.constant 0 : index
    %c0_4 = arith.constant 0 : index
    %3 = vector.load %arg3[%c0_3, %c0_4] : memref<128x128xf32, #tpu.memory_space<vmem>>, vector<128x128xf32>
    tpu.vector_store %arg3[%c0_3, %c0_4], %2 {strides = array<i32>} : memref<128x128xf32, #tpu.memory_space<vmem>>, vector<128x128xf32>,
    return
  }
  func.func @transform_0(%arg0: i32) -> (i32, i32) {
    %c0_i32 = arith.constant 0 : i32
    %c0_i32_0 = arith.constant 0 : i32
    return %arg0, %c0_i32 : i32, i32
  }
  func.func @transform_1(%arg0: i32) -> (i32, i32) {
    %c0_i32 = arith.constant 0 : i32
    %c0_i32_0 = arith.constant 0 : i32
    %c0_i32_1 = arith.constant 0 : i32
    return %c0_i32, %c0_i32_0 : i32, i32
  }
  func.func @transform_2(%arg0: i32) -> (i32, i32) {
    %c0_i32 = arith.constant 0 : i32
    %c0_i32_0 = arith.constant 0 : i32
    return %arg0, %c0_i32 : i32, i32
  }
}

</mosaic_0001>

<bundles_post_ra>
// kernel: tpu_custom_call.1
= control target key start
LH: loop header
LB: loop body
LE: loop exit
PB: predicated region body
PF: predicated region fallthrough
CT: control target
= control target key end

     0   :  { %7 = vsyncpa [#allocation3], 0  ;;  %s800_s0 = inlined_call_operand.vmem [shape: f32[256,16], index: 0, kind: input, shape index: {}]   ;;  %s801_s1 = inlined_call_operand.vmem [shape: f32[16,128], index: 1, kind: input, shape index: {}]   ;;  %s802_s2 = inlined_call_operand.hbm [shape: f32[256,128], index: 2, kind: output, shape index: {}]  }
   0x1   :  { %9 = vsyncpa [#allocation3 + $0x1], 0  ;;  %s653_s9 = smov 0   ;;  %s655_s10 = smov 0  }
   0x2   :  { %s657_s11 = smov 0   ;;  %s659_s12 = smov 0  }
   0x3 LB: > { %s674_s13 = sadd.s32 4294967295, %s633_s12   ;;  %s449_s14 = sadd.s32 4294967294, %s633_s12   ;;  %s633_s12 = sphi %s659_s12, %s808_s12   ;;  %s629_s11 = sphi %s657_s11, %s807_s11   ;;  %s625_s10 = sphi %s655_s10, %s806_s10   ;;  %s621_s9 = sphi %s653_s9, %s805_s9  }
   0x4   : > { %s678_s15 = sadd.s32 1, %s633_s12   ;;  %s69_s16 = sadd.s32 1, %s629_s11 }
   0x5   : > { %s66_s17 = ssub.s32 %s633_s12, %s678_s15  ;;  %p79_p0 = scmp.ne.s32.totalorder %s629_s11, %s625_s10 }
   0x6   : > { %p67_p1 = scmp.eq.s32.totalorder %s66_s17, 0  ;;  %p80_p2 = scmp.eq.s32.totalorder %s674_s13, 1 }
   0x7   : > { %p85_p3 = scmp.ne.s32.totalorder %s625_s10, %s621_s9  ;;  %p86_p4 = scmp.eq.s32.totalorder %s449_s14, 1 }
   0x8   : > { %s689_s18 = scalar_select %p67_p1, %s629_s11, %s69_s16  }
   0x9   : > { %p691_p5 = por %p80_p2, %p79_p0  ;;  %p695_p6 = por %p86_p4, %p85_p3 }
   0xa   : > { %p452_p7 = scmp.ge.s32.totalorder %s633_s12, 1  ;;  %p116_p8 = scmp.lt.s32.totalorder %s633_s12, 3 }
   0xc   : > { %p117_p9 = pnand %p452_p7, %p116_p8 }
   0xd   : > { %v161_v0 = vld [vmem:[%s801_s1] sm:$0xff] (!%p117_p9)  ;;  %v162_v1 = vld [vmem:[%s801_s1 + $0x8] sm:$0xff] (!%p117_p9)  ;;  %s454_s25 = sshll.u32 (!%p117_p9), %s674_s13, 4  ;;  %vm163_vm0 = vcmask (!%p117_p9), 130048   ;;  %s135_s30 = sand.u32 (!%p117_p9), 1, %s625_s10  }
   0xe   : > { %120 = sbr.rel (%p117_p9) target bundleno = 267 (0x10b), region = 28  ;;  %v524_v2 = vpack.c.bf16 (!%p117_p9), %v162_v1, %v161_v0  ;;  %p139_p10 = scmp.lt.s32.totalorder (!%p117_p9), %s454_s25, 31 }
   0xf   : > { %s453_s3 = sshll.u32 (!%p117_p9), %s135_s30, 7  ;;  %s477_s5 = sshll.u32 (!%p117_p9), %s674_s13, 11 }
  0x10   : > { %525 = vmatprep.subr.bf16.mxu0 (!%p117_p9), %v524_v2  ;;  %528 = vmatprep.subr.bf16.mxu1 (!%p117_p9), %v524_v2  ;;  %s730_s4 = scalar_lea.vmem (!%p117_p9), [#allocation2], %s453_s3  ;;  %s749_s14 = scalar_lea.hbm (!%p117_p9), %s802_s2, %s477_s5 }
  0x11   : > { %527 = vmatpush3.bf16.msra.mxu0 (!%p117_p9), %v524_v2  ;;  %529 = vmatpush3.bf16.msra.mxu1 (!%p117_p9), %v524_v2  ;;  %s387_s6 = sshll.u32 (!%p117_p9), %s730_s4, 4  ;;  %s759_s13 = scalar_lea.sflag (!%p117_p9), [#allocation3], %s135_s30  ;;  %s751_s6 = int_to_ptr.vmem [resolvable:$true] %s387_s6 }
  0x12   : > { %s571_s16 = scalar_lea.vmem (!%p117_p9), %s751_s6, 2048  ;;  %s635_s17 = smov (!%p117_p9), [#allocation2]  }
  0x13   : > { %p572_p11 = scmp.ne.s32.totalorder (!%p117_p9), %s751_s6, %s571_s16  ;;  %s575_s21 = sshll.u32 (!%p117_p9), %s635_s17, 4  ;;  %s576_s21 = int_to_ptr.vmem [resolvable:$false] %s575_s21 }
  0x14   : > { %s577_s22 = scalar_lea.vmem (!%p117_p9), %s576_s21, 4096  ;;  %p578_p0 = scmp.lt.s32.totalorder (!%p117_p9), %s751_s6, %s576_s21 }
  0x15   : > { %s810_s25 = smov (!%p139_p10, %s454_s25), 31  ;;  %p573_p12 = pnand %p572_p11, %p691_p5 }
  0x16   : > { %s455_s26 = sshll.u32 %s810_s25, 3  ;;  %p579_p1 = scmp.lt.s32.totalorder %s577_s22, %s571_s16 }
  0x17   : > { %s142_s29 = scalar_lea.vmem %s800_s0, %s455_s26  ;;  %p574_p13 = pneg %p573_p12 }
  0x18   : > { %v145_v3 = vld [vmem:[%s142_s29] sm:$0xff]  ;;  %v146_v5 = vld [vmem:[%s142_s29 + $0x8] sm:$0xff]  ;;  %v147_v7 = vld [vmem:[%s142_s29 + $0x10] sm:$0xff]  ;;  %p580_p2 = por %p579_p1, %p578_p0 }
  0x19   : > { %v153_v4 = vld [vmem:[%s142_s29 + $0x40] sm:$0xff]  ;;  %500 = vmatprep.mubr.msk.f32.mxu0 %vm163_vm0, %v145_v3  ;;  %v154_v6 = vld [vmem:[%s142_s29 + $0x48] sm:$0xff]  ;;  %v155_v8 = vld [vmem:[%s142_s29 + $0x50] sm:$0xff] }
  0x1a   : > { %512 = vmatprep.mubr.msk.f32.mxu1 %vm163_vm0, %v153_v4  ;;  %501 = vmatmul.mubr.msk.f32.vlgmr.msra.gmra.mrb[0].mxu0 %vm163_vm0, %v146_v5  ;;  %v148_v9 = vld [vmem:[%s142_s29 + $0x18] sm:$0xff]  ;;  %v149_v11 = vld [vmem:[%s142_s29 + $0x20] sm:$0xff]  ;;  %v150_v13 = vld [vmem:[%s142_s29 + $0x28] sm:$0xff]  ;;  %p581_p3 = pnand %p580_p2, %p574_p13 }
  0x1b   : > { %513 = vmatmul.mubr.msk.f32.vlgmr.msra.gmra.mrb[0].mxu1 %vm163_vm0, %v154_v6  ;;  %503 = vmatprep.mubr.msk.f32.mxu0 %vm163_vm0, %v147_v7  ;;  %v156_v10 = vld [vmem:[%s142_s29 + $0x58] sm:$0xff]  ;;  %v157_v12 = vld [vmem:[%s142_s29 + $0x60] sm:$0xff]  ;;  %v158_v14 = vld [vmem:[%s142_s29 + $0x68] sm:$0xff] }
  0x1c   : > { %515 = vmatprep.mubr.msk.f32.mxu1 %vm163_vm0, %v155_v8  ;;  %v151_v15 = vld [vmem:[%s142_s29 + $0x30] sm:$0xff]  ;;  %v152_v17 = vld [vmem:[%s142_s29 + $0x38] sm:$0xff] }
  0x1d   : > { %v159_v16 = vld [vmem:[%s142_s29 + $0x70] sm:$0xff]  ;;  %v160_v18 = vld [vmem:[%s142_s29 + $0x78] sm:$0xff] }
  0x1e   : > { %504 = vmatmul.mubr.msk.f32.gmra.mrb[2].mxu0 %vm163_vm0, %v148_v9 }
  0x1f   : > { %516 = vmatmul.mubr.msk.f32.gmra.mrb[2].mxu1 %vm163_vm0, %v156_v10  ;;  %506 = vmatprep.mubr.msk.f32.mxu0 %vm163_vm0, %v149_v11 }
  0x20   : > { %518 = vmatprep.mubr.msk.f32.mxu1 %vm163_vm0, %v157_v12 }
  0x22   : > { %507 = vmatmul.mubr.msk.f32.gmra.mrb[4].mxu0 %vm163_vm0, %v150_v13 }
  0x23   : > { %519 = vmatmul.mubr.msk.f32.gmra.mrb[4].mxu1 %vm163_vm0, %v158_v14  ;;  %509 = vmatprep.mubr.msk.f32.mxu0 %vm163_vm0, %v151_v15 }
  0x24   : > { %521 = vmatprep.mubr.msk.f32.mxu1 %vm163_vm0, %v159_v16 }
  0x26   : > { %510 = vmatmul.mubr.msk.f32.gmra.mrb[6].mxu0 %vm163_vm0, %v152_v17 }
  0x27   : > { %522 = vmatmul.mubr.msk.f32.gmra.mrb[6].mxu1 %vm163_vm0, %v160_v18 }
  0xed   : > { %v502_v19 = vpop.f32.mrb[0].mxu0 }
  0xee   : > { %v514_v20 = vpop.f32.mrb[0].mxu1  ;;  %358 = vst [vmem:[%s730_s4 + $0x8] sm:$0xff] %v502_v19  ;;  %v278_v21 = vpop.f32.mrb[1].mxu0 }
  0xef   : > { %366 = vst [vmem:[%s730_s4 + $0x48] sm:$0xff] %v514_v20  ;;  %v318_v22 = vpop.f32.mrb[1].mxu1  ;;  %357 = vst [vmem:[%s730_s4] sm:$0xff] %v278_v21 }
  0xf0   : > { %365 = vst [vmem:[%s730_s4 + $0x40] sm:$0xff] %v318_v22 }
  0xf1   : > { %v505_v23 = vpop.f32.mrb[2].mxu0 }
  0xf2   : > { %v517_v24 = vpop.f32.mrb[2].mxu1  ;;  %360 = vst [vmem:[%s730_s4 + $0x18] sm:$0xff] %v505_v23  ;;  %v288_v25 = vpop.f32.mrb[3].mxu0 }
  0xf3   : > { %368 = vst [vmem:[%s730_s4 + $0x58] sm:$0xff] %v517_v24  ;;  %v328_v26 = vpop.f32.mrb[3].mxu1  ;;  %359 = vst [vmem:[%s730_s4 + $0x10] sm:$0xff] %v288_v25 }
  0xf4   : > { %367 = vst [vmem:[%s730_s4 + $0x50] sm:$0xff] %v328_v26 }
  0xf5   : > { %v508_v27 = vpop.f32.mrb[4].mxu0 }
  0xf6   : > { %v520_v28 = vpop.f32.mrb[4].mxu1  ;;  %362 = vst [vmem:[%s730_s4 + $0x28] sm:$0xff] %v508_v27  ;;  %v298_v29 = vpop.f32.mrb[5].mxu0 }
  0xf7   : > { %370 = vst [vmem:[%s730_s4 + $0x68] sm:$0xff] %v520_v28  ;;  %v338_v30 = vpop.f32.mrb[5].mxu1  ;;  %361 = vst [vmem:[%s730_s4 + $0x20] sm:$0xff] %v298_v29 }
  0xf8   : > { %369 = vst [vmem:[%s730_s4 + $0x60] sm:$0xff] %v338_v30 }
  0xf9   : > { %v511_v31 = vpop.f32.mrb[6].mxu0 }
  0xfa   : > { %v523_v32 = vpop.f32.mrb[6].mxu1  ;;  %364 = vst [vmem:[%s730_s4 + $0x38] sm:$0xff] %v511_v31  ;;  %v308_v33 = vpop.f32.mrb[7].mxu0 }
  0xfb   : > { %372 = vst [vmem:[%s730_s4 + $0x78] sm:$0xff] %v523_v32  ;;  %v348_v34 = vpop.f32.mrb[7].mxu1  ;;  %363 = vst [vmem:[%s730_s4 + $0x30] sm:$0xff] %v308_v33 }
  0xfc   : > { %371 = vst [vmem:[%s730_s4 + $0x70] sm:$0xff] %v348_v34 }
  0xfd   : > { %584 = shalt.err (!%p581_p3)
}
  0xfe   : > { %s585_s23 = scalar_lea.hbm %s749_s14, 2048  ;;  %s589_s26 = scalar_lea.hbm %s802_s2, 4096 }
  0xff   : > { %p586_p4 = scmp.ne.s32.totalorder %s749_s14, %s585_s23  ;;  %p590_p9 = scmp.lt.u32.totalorder %s749_s14, %s802_s2 }
 0x100   : > { %p591_p10 = scmp.lt.u32.totalorder %s589_s26, %s585_s23  ;;  %p593_p12 = scmp.lt.u32.totalorder %s585_s23, %s749_s14 }
 0x101   : > { %p587_p7 = pnand %p586_p4, %p691_p5 }
 0x102   : > { %p592_p11 = por %p591_p10, %p590_p9 }
 0x103   : > { %p588_p8 = pneg %p587_p7 }
 0x104   : > { %p594_p13 = por %p593_p12, %p592_p11 }
 0x106   : > { %p595_p0 = pnand %p594_p13, %p588_p8 }
 0x108   : > { %598 = shalt.err (!%p595_p0)
}
 0x109   : > { %s636_s29 = smov 128   ;;  %s637_s30 = smov 8  }
 0x10a   : > { %530 = dma.vmem_to_hbm [thread:$0]  (%p691_p5), %s751_s6, 2048, %s749_s14, %s759_s13, %s636_s29, %s636_s29, %s637_s30  }
 0x10b PF: > { %p536_p1 = scmp.ge.s32.totalorder %s633_s12, 2  ;;  %s402_s3 = sand.u32 1, %s621_s9  }
 0x10c   : > { %s403_s4 = scalar_lea.sflag [#allocation3], %s402_s3 }
 0x10d   : > { %p533_p2 = pnand %p536_p1, %p695_p6 }
 0x10f   : > { %616 = dma.done.wait (!%p533_p2), %s403_s4, 2048  }
 0x110   : > { %618 = vsyncadd (!%p533_p2), %s403_s4, 4294965248  ;;  %p12_p3 = scmp.ge.s32.totalorder %s678_s15, 4   ;;  %s805_s9 = smov %s625_s10 }
 0x111   : > { %s806_s10 = smov %s629_s11  ;;  %s807_s11 = smov %s689_s18 }
 0x112   : > { %s808_s12 = smov %s678_s15  ;;  %14 = sbr.rel (!%p12_p3) target bundleno = 3 (0x3), region = 63 }
 0x119   :  { %408 = vsyncpa [#allocation3], 1 }
 0x11a   :  { %410 = vsyncpa [#allocation3 + $0x1], 1 }

</bundles_post_ra>
